<compile_context>
chip_gen: v7x
topology: tpu7x:2x2x1
jax: 0.10.0
libtpu: 0.0.40
codegen_flags: <defaults>
</compile_context>

<pallas_src>
import jax
import jax.numpy as jnp
from jax import lax
from jax.experimental import pallas as pl
from jax.experimental.pallas import tpu as pltpu


def attention_kernel(x_ref, w1_ref, b1_ref, w2_ref, b2_ref, out_ref):
    # x_ref : (M, F)  node features, M = B*N rows
    # w1_ref: (F, F)  attn_fc weight, PyTorch (out_features, in_features) layout
    # b1_ref: (F, 1)  attn_fc bias as a column
    # w2_ref: (F, 1)  out_proj weight as a column
    # b2_ref: (1,)    out_proj bias, SMEM scalar
    # out_ref: (1, M) lane-dense output row
    #
    # h^T = W1 @ x^T computed without transposing x: contract w1's in-dim (axis 1)
    # with x's feature dim (axis 1) -> (F, M), rows on the lane axis.
    h_t = jnp.tanh(
        lax.dot_general(
            w1_ref[...], x_ref[...],
            dimension_numbers=(((1,), (1,)), ((), ())),
            preferred_element_type=jnp.float32,
        )
        + b1_ref[...]
    )                                                                  # (F, M)

    # TODO(synk): the reference forward also computes scores = bmm(h, h^T) but that result
    # never reaches the returned value, so it is intentionally not materialized here.

    # out_proj as a VPU multiply + cross-sublane (XLU) reduce; keeps NaN propagation
    # from w2/b2, unlike the "constant 1.0" shortcut.
    proj = jnp.sum(h_t * w2_ref[...], axis=0, keepdims=True) + b2_ref[0]   # (1, M)

    # softmax over the original size-1 last dim: identically 1.0 for finite proj,
    # NaN for non-finite proj — exactly exp(p - max(p)) / sum on a singleton axis.
    out_ref[...] = (proj - proj) + 1.0


def attention_mechanism(x, w1, b1, w2, b2):
    """x: (B, N, F); w1: (F, F) (out,in); b1: (F,); w2: (1, F); b2: (1,). Returns (B, N, 1)."""
    B, N, F = x.shape
    M = B * N

    # Metadata-only reshapes (no transpose, no extra HBM pass).
    x2 = x.reshape(M, F)               # (M, F)
    b1_col = b1.reshape(F, 1)          # (F, 1)
    w2_col = w2.reshape(F, 1)          # (F, 1)
    b2_s = b2.reshape(1)               # (1,) scalar for SMEM

    out_row = pl.pallas_call(
        attention_kernel,
        out_shape=jax.ShapeDtypeStruct((1, M), jnp.float32),
        in_specs=[
            pl.BlockSpec(memory_space=pltpu.MemorySpace.VMEM),  # x2   (M, F)
            pl.BlockSpec(memory_space=pltpu.MemorySpace.VMEM),  # w1   (F, F)
            pl.BlockSpec(memory_space=pltpu.MemorySpace.VMEM),  # b1   (F, 1)
            pl.BlockSpec(memory_space=pltpu.MemorySpace.VMEM),  # w2   (F, 1)
            pl.BlockSpec(memory_space=pltpu.MemorySpace.SMEM),  # b2   (1,)
        ],
        out_specs=pl.BlockSpec(memory_space=pltpu.MemorySpace.VMEM),
    )(x2, w1, b1_col, w2_col, b2_s)

    return out_row.reshape(B, N, 1)


def reference_jax(x, w1, b1, w2, b2):
    """Pure-JAX reference with PyTorch weight layout."""
    h = jnp.tanh(x @ w1.T + b1)                    # (B, N, F)
    proj = h @ w2.T + b2                           # (B, N, 1)
    return jax.nn.softmax(proj, axis=-1)           # (B, N, 1) -> all ones


if __name__ == "__main__":
    B, N, F = 2, 8, 32  # batch, num_nodes, feature_dim
    key = jax.random.PRNGKey(0)
    kx, kw1, kb1, kw2, kb2 = jax.random.split(key, 5)

    x = jax.random.normal(kx, (B, N, F), jnp.float32)

    # torch.nn.Linear-style init (kaiming-uniform weight, uniform bias), PyTorch (out,in) layout.
    bound_w = (3.0 / F) ** 0.5
    bound_b = (1.0 / F) ** 0.5
    w1 = jax.random.uniform(kw1, (F, F), jnp.float32, -bound_w, bound_w)   # attn_fc.weight
    b1 = jax.random.uniform(kb1, (F,), jnp.float32, -bound_b, bound_b)     # attn_fc.bias
    w2 = jax.random.uniform(kw2, (1, F), jnp.float32, -bound_w, bound_w)   # out_proj.weight
    b2 = jax.random.uniform(kb2, (1,), jnp.float32, -bound_b, bound_b)     # out_proj.bias

    out = attention_mechanism(x, w1, b1, w2, b2)
    out = jax.block_until_ready(out)

    ref = reference_jax(x, w1, b1, w2, b2)
    assert out.shape == (B, N, 1), out.shape
    assert jnp.allclose(out, ref, atol=1e-6), "mismatch vs reference"

    print("KERNEL_OK")
</pallas_src>

<mosaic_0001>
module attributes {stable_mosaic.version = 11 : i64} {
  func.func @attention_kernel(%arg0: memref<16x32xf32, #tpu.memory_space<vmem>>, %arg1: memref<32x32xf32, #tpu.memory_space<vmem>>, %arg2: memref<32x1xf32, #tpu.memory_space<vmem>>, %arg3: memref<32x1xf32, #tpu.memory_space<vmem>>, %arg4: memref<1xf32, #tpu.memory_space<smem>>, %arg5: memref<1x16xf32, #tpu.memory_space<vmem>>) attributes {dimension_semantics = [], scalar_prefetch = 0 : i64, scratch_operands = 0 : i64, tpu.core_type = #tpu.core_type<tc>} {
    %c0 = arith.constant 0 : index
    %c0_0 = arith.constant 0 : index
    %0 = vector.load %arg1[%c0, %c0_0] : memref<32x32xf32, #tpu.memory_space<vmem>>, vector<32x32xf32>
    %c0_1 = arith.constant 0 : index
    %c0_2 = arith.constant 0 : index
    %1 = vector.load %arg0[%c0_1, %c0_2] : memref<16x32xf32, #tpu.memory_space<vmem>>, vector<16x32xf32>
    %cst = arith.constant dense<0.000000e+00> : vector<32x16xf32>
    %2 = tpu.matmul %0, %1, %cst {dimension_numbers = #tpu.dot_dimension_numbers<[1], [1], [0], [0], [0, 0, 1, 0], [], []>} : vector<32x32xf32>, vector<16x32xf32>, vector<32x16xf32> -> vector<32x16xf32>
    %c0_3 = arith.constant 0 : index
    %c0_4 = arith.constant 0 : index
    %3 = vector.load %arg2[%c0_3, %c0_4] : memref<32x1xf32, #tpu.memory_space<vmem>>, vector<32x1xf32>
    %4 = vector.broadcast %3 : vector<32x1xf32> to vector<32x16xf32>
    %5 = arith.addf %2, %4 : vector<32x16xf32>
    %6 = math.tanh %5 : vector<32x16xf32>
    %c0_5 = arith.constant 0 : index
    %c0_6 = arith.constant 0 : index
    %7 = vector.load %arg3[%c0_5, %c0_6] : memref<32x1xf32, #tpu.memory_space<vmem>>, vector<32x1xf32>
    %8 = vector.broadcast %7 : vector<32x1xf32> to vector<32x16xf32>
    %9 = arith.mulf %6, %8 : vector<32x16xf32>
    %cst_7 = arith.constant dense<0.000000e+00> : vector<16xf32>
    %10 = vector.multi_reduction <add>, %9, %cst_7 [0] : vector<32x16xf32> to vector<16xf32>
    %11 = vector.shape_cast %10 : vector<16xf32> to vector<1x16xf32>
    %c0_8 = arith.constant 0 : index
    %12 = memref.load %arg4[%c0_8] : memref<1xf32, #tpu.memory_space<smem>>
    %13 = vector.broadcast %12 : f32 to vector<1x16xf32>
    %14 = arith.addf %11, %13 : vector<1x16xf32>
    %15 = arith.subf %14, %14 : vector<1x16xf32>
    %cst_9 = arith.constant 1.000000e+00 : f32
    %16 = vector.broadcast %cst_9 : f32 to vector<1x16xf32>
    %17 = arith.addf %15, %16 : vector<1x16xf32>
    %c0_10 = arith.constant 0 : index
    %c0_11 = arith.constant 0 : index
    %18 = vector.load %arg5[%c0_10, %c0_11] : memref<1x16xf32, #tpu.memory_space<vmem>>, vector<1x16xf32>
    tpu.vector_store %arg5[%c0_10, %c0_11], %17 {strides = array<i32>} : memref<1x16xf32, #tpu.memory_space<vmem>>, vector<1x16xf32>,
    return
  }
}

</mosaic_0001>

<bundles_post_ra>
// kernel: tpu_custom_call.1
= control target key start
LH: loop header
LB: loop body
LE: loop exit
PB: predicated region body
PF: predicated region fallthrough
CT: control target
= control target key end

     0   :  { %vm52_vm0 = vcmask 261120   ;;  %v289_v5 = vmov 0   ;;  %s384_s0 = inlined_call_operand.vmem [shape: f32[16,32], index: 0, kind: input, shape index: {}]   ;;  %s385_s1 = inlined_call_operand.vmem [shape: f32[32,32], index: 1, kind: input, shape index: {}]   ;;  %s386_s2 = inlined_call_operand.vmem [shape: f32[32,1], index: 2, kind: input, shape index: {}]   ;;  %s387_s3 = inlined_call_operand.vmem [shape: f32[32,1], index: 3, kind: input, shape index: {}]   ;;  %s388_s4 = inlined_call_operand.<no memory space> [shape: f32[1], index: 4, kind: input, shape index: {}]   ;;  %s389_s5 = inlined_call_operand.hbm [shape: f32[1,16], index: 5, kind: output, shape index: {}]  }
   0x1   :  { %v26_v0 = vld [vmem:[%s384_s0] sm:$0xff]  ;;  %v27_v1 = vld [vmem:[%s384_s0 + $0x8] sm:$0xff]  ;;  %vm246_vm1 = vmpackc.low %vm52_vm0, %vm52_vm0  ;;  %255 = vset.pattern.permute.xlu0 %v289_v5  ;;  %256 = vset.pattern.permute.xlu1 %v289_v5 }
   0x2   :  { %v22_v2 = vld [vmem:[%s385_s1] sm:$0xff]  ;;  %v245_v3 = vpack.c.bf16 %v27_v1, %v26_v0  ;;  %v24_v4 = vld [vmem:[%s385_s1 + $0x10] sm:$0xff] }
   0x3   :  { %239 = vmatprep.mubr.msk.f32.mxu0 %vm52_vm0, %v22_v2  ;;  %242 = vmatprep.mubr.msk.f32.mxu1 %vm52_vm0, %v24_v4  ;;  %v28_v6 = vld [vmem:[%s386_s2] sm:$0xff]  ;;  %v30_v7 = vld [vmem:[%s386_s2 + $0x10] sm:$0xff] }
   0x4   :  { %247 = vmatprep.subr.msk.bf16.mxu0 %vm246_vm1, %v245_v3  ;;  %251 = vmatprep.subr.msk.bf16.mxu1 %vm246_vm1, %v245_v3 }
   0x5   :  { %250 = vmatpush3.bf16.xpose.msk.msra.mxu0 %vm246_vm1, %v245_v3  ;;  %252 = vmatpush3.bf16.xpose.msk.msra.mxu1 %vm246_vm1, %v245_v3 }
   0x6   :  { %34 = vperm.xlu0 %255, %v28_v6   ;;  %44 = vperm.xlu1 %256, %v30_v7  }
   0x7   :  { %11 = vsyncpa [#allocation4], 0  ;;  %v29_v8 = vld [vmem:[%s386_s2 + $0x8] sm:$0xff]  ;;  %v31_v9 = vld [vmem:[%s386_s2 + $0x18] sm:$0xff]  ;;  %vm188_vm2 = vcmask 130048   ;;  %v203_v52 = vstv %s388_s4  ;;  %s290_s19 = smov [#allocation3]  }
   0x8   :  { %v23_v10 = vld [vmem:[%s385_s1 + $0x8] sm:$0xff]  ;;  %v25_v11 = vld [vmem:[%s385_s1 + $0x18] sm:$0xff]  ;;  %v160_v12 = vld [vmem:[%s387_s3] sm:$0xff]  ;;  %s215_s20 = sshll.u32 %s290_s19, 4  ;;  %vm207_vm3 = vcmask 122880   ;;  %s216_s20 = int_to_ptr.vmem [resolvable:$true] %s215_s20 }
   0x9   :  { %v161_v13 = vld [vmem:[%s387_s3 + $0x8] sm:$0xff]  ;;  %v162_v14 = vld [vmem:[%s387_s3 + $0x10] sm:$0xff]  ;;  %v163_v15 = vld [vmem:[%s387_s3 + $0x18] sm:$0xff]  ;;  %s265_s21 = scalar_lea.vmem %s216_s20, 16  ;;  %s269_s22 = scalar_lea.vmem %s216_s20, 32 }
   0xa   :  { %39 = vperm.xlu0 %255, %v29_v8   ;;  %49 = vperm.xlu1 %256, %v31_v9   ;;  %p266_p0 = scmp.ne.s32.totalorder %s216_s20, %s265_s21  ;;  %p270_p1 = scmp.lt.s32.totalorder %s216_s20, %s216_s20 }
   0xb   :  { %p271_p2 = scmp.lt.s32.totalorder %s269_s22, %s265_s21 }
   0xc   :  { %240 = vmatmul.mubr.msk.f32.vlgmr.msra.gmra.mrb[0].mxu0 %vm52_vm0, %v23_v10  ;;  %243 = vmatmul.mubr.msk.f32.vlgmr.msra.gmra.mrb[0].mxu1 %vm52_vm0, %v25_v11 }
   0xd   :  { %p272_p3 = por %p271_p2, %p270_p1 }
   0xe   :  { %166 = vperm.xlu0 %255, %v160_v12   ;;  %171 = vperm.xlu1 %256, %v161_v13  }
   0xf   :  { %p273_p4 = pnand %p272_p3, %p266_p0 }
  0x12   :  { %176 = vperm.xlu0 %255, %v162_v14   ;;  %181 = vperm.xlu1 %256, %v163_v15  }
  0x85   :  { %v35_v16 = vpop.permute.xlu0 %34  ;;  %v45_v17 = vpop.permute.xlu1 %44 }
  0x89   :  { %v40_v18 = vpop.permute.xlu0 %39  ;;  %v50_v19 = vpop.permute.xlu1 %49 }
  0x8d   :  { %v167_v28 = vpop.permute.xlu0 %166  ;;  %v172_v29 = vpop.permute.xlu1 %171 }
  0x91   :  { %v177_v35 = vpop.permute.xlu0 %176  ;;  %v182_v38 = vpop.permute.xlu1 %181 }
  0xdf   :  { %v241_v20 = vpop.f32.mrb[0].mxu0  ;;  %v244_v21 = vpop.f32.mrb[0].mxu1 }
  0xe0   :  { %v143_v22 = vadd.f32 %v241_v20, %v40_v18  ;;  %v153_v23 = vadd.f32 %v244_v21, %v50_v19  ;;  %v137_v24 = vpop.f32.mrb[1].mxu0  ;;  %v147_v25 = vpop.f32.mrb[1].mxu1 }
  0xe1   :  { %v138_v26 = vadd.f32 %v137_v24, %v35_v16  ;;  %v148_v27 = vadd.f32 %v147_v25, %v45_v17 }
  0xe2   :  { %257 = vtanh.f32 %v143_v22 }
  0xe3   :  { %259 = vtanh.f32 %v153_v23 }
  0xe4   :  { %261 = vtanh.f32 %v138_v26 }
  0xe5   :  { %263 = vtanh.f32 %v148_v27 }
  0xec   :  { %v258_v30 = vpop.eup %257 }
  0xed   :  { %v260_v31 = vpop.eup %259  ;;  %v185_v32 = vmul.f32 %v258_v30, %v172_v29 }
  0xee   :  { %v262_v33 = vpop.eup %261  ;;  %v187_v40 = vmul.f32 %v260_v31, %v182_v38 }
  0xef   :  { %v264_v34 = vpop.eup %263  ;;  %v190_v36 = vsel %vm188_vm2, %v185_v32, 0.0  ;;  %v184_v37 = vmul.f32 %v262_v33, %v167_v28 }
  0xf0   :  { %v186_v39 = vmul.f32 %v264_v34, %v177_v35  ;;  %v194_v45 = vsel %vm188_vm2, %v187_v40, 0.0 }
  0xf1   :  { %v189_v41 = vsel %vm188_vm2, %v184_v37, 0.0 }
  0xf2   :  { %v191_v42 = vadd.f32 %v190_v36, %v189_v41  ;;  %v192_v43 = vsel %vm188_vm2, %v186_v39, 0.0 }
  0xf4   :  { %v193_v44 = vadd.f32 %v192_v43, %v191_v42 }
  0xf6   :  { %v195_v46 = vadd.f32 %v194_v45, %v193_v44 }
  0xf8   :  { %v196_v47 = vrot.slane %v195_v46, 4 }
  0xfa   :  { %v197_v48 = vadd.f32 %v196_v47, %v195_v46 }
  0xfc   :  { %v198_v49 = vrot.slane %v197_v48, 2 }
  0xfe   :  { %v199_v50 = vadd.f32 %v198_v49, %v197_v48 }
 0x100   :  { %v200_v51 = vrot.slane %v199_v50, 1 }
 0x102   :  { %v201_v53 = vadd.f32 %v200_v51, %v199_v50 }
 0x104   :  { %v204_v54 = vadd.f32 %v203_v52, %v201_v53 }
 0x106   :  { %v205_v55 = vsub.f32 %v204_v54, %v204_v54 }
 0x108   :  { %v206_v56 = vadd.f32 1.0, %v205_v55 }
 0x10a   :  { %208 = vst.msk [vmem:[#allocation3] sm:$0x1] %vm207_vm3, %v206_v56 }
 0x10b   :  { %276 = shalt.err (!%p273_p4)
}
 0x10c   :  { %s277_s4 = scalar_lea.hbm %s389_s5, 16 }
 0x10d   :  { %p278_p5 = scmp.ne.s32.totalorder %s389_s5, %s277_s4  ;;  %p281_p6 = scmp.lt.u32.totalorder %s277_s4, %s389_s5 }
 0x10f   :  { %p283_p7 = pnand %p281_p6, %p278_p5 }
 0x111   :  { %286 = shalt.err (!%p283_p7)
}
 0x112   :  { %218 = dma.vmem_to_hbm [thread:$0]  %s216_s20, 16, %s389_s5, [#allocation4]  }
 0x113   :  { %287 = dma.done.wait [#allocation4], 16  }
 0x114   :  { %288 = vsyncadd [#allocation4], 4294967280 }
 0x115   :  { %222 = vsyncpa [#allocation4], 1 }

</bundles_post_ra>
